<compile_context>
chip_gen: v7x
topology: tpu7x:2x2x1
jax: 0.10.0
libtpu: 0.0.40
codegen_flags: <defaults>
</compile_context>

<pallas_src>
import math

import jax
import jax.numpy as jnp
from jax.experimental import pallas as pl
from jax.experimental.pallas import tpu as pltpu


def _round_up(x, m):
    return (x + m - 1) // m * m


# -----------------------------------------------------------------------------
# Kernel: out = ReLU(x @ W1 + b1) @ W2 + b2
# Grid = (col_splits, m_tiles, n_tiles_per_split); the hidden activation is
# computed once per (split, m-tile) (j == 0), cached in VMEM scratch and reused
# for every output-column tile of that split.
# -----------------------------------------------------------------------------
def _head_kernel(x_ref, w1_ref, b1_ref, w2_ref, b2_ref, o_ref, h_ref):
    @pl.when(pl.program_id(2) == 0)
    def _():
        # Linear(H->H) + Dropout(eval = identity) + ReLU.
        # TODO(synk): training-mode dropout (pltpu.prng_* Bernoulli mask) not
        # implemented; forward matches eval()/inference semantics.
        h = jnp.dot(x_ref[...], w1_ref[...], preferred_element_type=jnp.float32)
        h = h + b1_ref[...]
        h_ref[...] = jnp.maximum(h, 0.0).astype(h_ref.dtype)

    o = jnp.dot(h_ref[...], w2_ref[...], preferred_element_type=jnp.float32)
    o = o + b2_ref[...]
    o_ref[...] = o.astype(o_ref.dtype)


# -----------------------------------------------------------------------------
# One-time weight packing (lane-dense padding + MXU dtype cast, done at init)
# -----------------------------------------------------------------------------
def pack_head_params(w1, b1, w2, b2, *, compute_dtype=jnp.bfloat16,
                     block_n=1024, col_splits=1):
    """Pad/cast head weights ONCE (out of the per-call path).

    col_splits: number of output-column shards (leading parallel grid axis).
    Set 2 on v7x so both TensorCores work on the wide vocab matmul; 1 is right
    for single-core v5e/v6e (still correct everywhere).
    """
    H = w1.shape[0]
    N = w2.shape[1]
    assert w1.shape == (H, H) and b1.shape == (H,)
    assert w2.shape == (H, N) and b2.shape == (N,)
    cd = jnp.dtype(compute_dtype)

    Hp = _round_up(H, 128)
    Np0 = _round_up(N, 128)
    n_tiles = max(pl.cdiv(Np0, block_n), 1)
    n_tiles = _round_up(n_tiles, col_splits)
    tn = _round_up(pl.cdiv(Np0, n_tiles), 128)
    Np = tn * n_tiles

    w1p = jnp.pad(w1, ((0, Hp - H), (0, Hp - H))).astype(cd)
    w2p = jnp.pad(w2, ((0, Hp - H), (0, Np - N))).astype(cd)
    b1p = jnp.pad(b1, (0, Hp - H)).astype(jnp.float32).reshape(1, Hp)
    b2p = jnp.pad(b2, (0, Np - N)).astype(jnp.float32).reshape(1, Np)

    return dict(w1=w1p, b1=b1p, w2=w2p, b2=b2p,
                H=H, N=N, Hp=Hp, Np=Np, tn=tn,
                col_splits=col_splits, compute_dtype=cd)


def _vmem_limit_bytes(tm, tn, Hp, cd_bytes, out_bytes, w2_bufs):
    need = (2 * tm * Hp * cd_bytes            # x tile (double-buffered)
            + Hp * Hp * cd_bytes + Hp * 4     # W1 + b1 (single-buffered)
            + w2_bufs * (Hp * tn * cd_bytes + 2 * tn * 4)
            + 2 * tm * tn * out_bytes         # output tile (double-buffered)
            + tm * Hp * cd_bytes)             # hidden-activation scratch
    need = int(need * 1.25) + (4 << 20)       # compiler-internal headroom
    try:
        cap = pltpu.get_tpu_info().vmem_capacity_bytes
    except Exception:
        cap = 64 << 20                        # conservative (v7x per-TC size)
    return max(min(need, cap * 3 // 4), 16 << 20)


# -----------------------------------------------------------------------------
# Fused head call (x padded per call; weights come pre-packed)
# -----------------------------------------------------------------------------
def fused_mlp_head(x, packed, *, block_m=512, out_dtype=None):
    """out = Linear(H->N)( ReLU( Linear(H->H)(x) ) ), fused in one Pallas call."""
    M, H = x.shape
    assert H == packed["H"], "hidden size mismatch with packed weights"
    cd = packed["compute_dtype"]
    Hp, Np, tn = packed["Hp"], packed["Np"], packed["tn"]
    col_splits = packed["col_splits"]
    N = packed["N"]
    out_dtype = jnp.dtype(x.dtype if out_dtype is None else out_dtype)

    # Even M split: last tile carries <8 rows of padding instead of ~a full tile.
    m_tiles = max(pl.cdiv(M, block_m), 1)
    tm = _round_up(pl.cdiv(M, m_tiles), 8)
    Mp = tm * m_tiles

    xp = jnp.pad(x, ((0, Mp - M), (0, Hp - H))).astype(cd)

    jt = Np // (tn * col_splits)              # column tiles per split
    grid = (col_splits, m_tiles, jt)
    w2_bufs = max(1, min(3, jt))

    cost = pl.CostEstimate(
        flops=2 * Mp * Hp * Hp * col_splits + 2 * Mp * Hp * Np,
        transcendentals=0,
        bytes_accessed=(xp.size * cd.itemsize
                        + packed["w1"].size * cd.itemsize
                        + packed["w2"].size * cd.itemsize
                        + packed["b1"].size * 4 + packed["b2"].size * 4
                        + Mp * Np * out_dtype.itemsize),
    )

    out = pl.pallas_call(
        _head_kernel,
        out_shape=jax.ShapeDtypeStruct((Mp, Np), out_dtype),
        grid_spec=pltpu.PrefetchScalarGridSpec(
            num_scalar_prefetch=0,
            grid=grid,
            in_specs=[
                # activation rows (per m-tile)
                pl.BlockSpec((tm, Hp), lambda s, i, j: (i, 0)),
                # grid-invariant W1 / b1: single buffer (free VMEM for W2/out)
                pl.BlockSpec((Hp, Hp), lambda s, i, j: (0, 0),
                             pipeline_mode=pl.Buffered(1)),
                pl.BlockSpec((1, Hp), lambda s, i, j: (0, 0),
                             pipeline_mode=pl.Buffered(1)),
                # streamed W2 column tile: deeper buffering hides the j==0 step
                pl.BlockSpec((Hp, tn), lambda s, i, j: (0, s * jt + j),
                             pipeline_mode=pl.Buffered(w2_bufs)),
                pl.BlockSpec((1, tn), lambda s, i, j: (0, s * jt + j)),
            ],
            out_specs=pl.BlockSpec((tm, tn), lambda s, i, j: (i, s * jt + j)),
            scratch_shapes=[pltpu.VMEM((tm, Hp), cd)],   # cached hidden act
        ),
        compiler_params=pltpu.CompilerParams(
            dimension_semantics=("parallel", "parallel", "arbitrary"),
            vmem_limit_bytes=_vmem_limit_bytes(
                tm, tn, Hp, cd.itemsize, out_dtype.itemsize, w2_bufs),
        ),
        cost_estimate=cost,
    )(xp, packed["w1"], packed["b1"], packed["w2"], packed["b2"])

    return out[:M, :N]


# ------------------------------- SSL_kbert glue -------------------------------

def pooler(feature, pooling):
    if pooling == "mean":
        return jnp.mean(feature, axis=1)
    elif pooling == "max":
        return jnp.max(feature, axis=1)
    elif pooling == "last":
        return feature[:, -1, :]
    else:  # 'first' / CLS token
        return feature[:, 0, :]


def ssl_kbert_classifier(bert_output_kg, packed, pooling="first"):
    """kg branch: logits = classifier(pooler(bert(tokens_kg, ...)))."""
    # TODO(synk): the K-BERT encoder (visible-matrix attention) is not
    # re-implemented; bert_output_kg stands in for its (B, S, H) output.
    pooled = pooler(bert_output_kg, pooling)            # (B, H)
    return fused_mlp_head(pooled, packed)               # (B, labels_num)


def ssl_kbert_decoder(bert_output_org, ssl_label, packed, *, max_pivots):
    """org branch: pivot_preds = decoder(output_org[ssl_label > 0]).

    Fixed-capacity gather (size=max_pivots) keeps the Pallas kernel at a
    static shape (no per-pivot-count recompiles). Returns (preds, n_pivots);
    rows >= n_pivots are padding and should be ignored by the caller.
    """
    B, S, H = bert_output_org.shape
    flat = bert_output_org.reshape(-1, H)
    flat_label = ssl_label.reshape(-1)
    (pivot_index,) = jnp.nonzero(flat_label > 0, size=max_pivots, fill_value=0)
    n_pivots = jnp.sum(flat_label > 0)
    # TODO(synk): could move this gather into the kernel via scalar-prefetched
    # indices + pl.Element row mapping to avoid the HBM gather copy.
    pivots = flat[pivot_index]                           # (max_pivots, H)
    preds = fused_mlp_head(pivots, packed)               # (max_pivots, vocab)
    return preds, n_pivots


# ------------------------------ init / reference ------------------------------

def _init_linear(key, fan_in, fan_out, dtype=jnp.float32):
    k_w, k_b = jax.random.split(key)
    bound = 1.0 / math.sqrt(fan_in)
    w = jax.random.uniform(k_w, (fan_in, fan_out), dtype, -bound, bound)
    b = jax.random.uniform(k_b, (fan_out,), dtype, -bound, bound)
    return w, b


def init_head(key, hidden, out_dim, dtype=jnp.float32):
    k1, k2 = jax.random.split(key)
    w1, b1 = _init_linear(k1, hidden, hidden, dtype)
    w2, b2 = _init_linear(k2, hidden, out_dim, dtype)
    return w1, b1, w2, b2


def _ref_head(x, w1, b1, w2, b2, compute_dtype=jnp.bfloat16):
    cd = jnp.dtype(compute_dtype)
    h = jnp.dot(x.astype(cd), w1.astype(cd),
                preferred_element_type=jnp.float32) + b1.astype(jnp.float32)
    h = jnp.maximum(h, 0.0).astype(cd)
    o = jnp.dot(h, w2.astype(cd),
                preferred_element_type=jnp.float32) + b2.astype(jnp.float32)
    return o.astype(x.dtype)


if __name__ == "__main__":
    B, S, H = 2, 8, 32
    LABELS, VOCAB = 2, 64
    MAX_PIVOTS = B * S

    key = jax.random.PRNGKey(0)
    k_kg, k_org, k_cls, k_dec, k_lbl = jax.random.split(key, 5)

    # stand-ins for the BERT encoder outputs
    bert_out_kg = jax.random.normal(k_kg, (B, S, H), jnp.float32)
    bert_out_org = jax.random.normal(k_org, (B, S, H), jnp.float32)

    cls_raw = init_head(k_cls, H, LABELS)
    dec_raw = init_head(k_dec, H, VOCAB)

    # weights packed (padded + bf16-cast) ONCE, outside the per-call path
    cls_packed = pack_head_params(*cls_raw)                    # single-core layout
    dec_packed = pack_head_params(*dec_raw, col_splits=2)      # v7x-friendly split

    ssl_label = jax.random.bernoulli(k_lbl, 0.3, (B, S)).astype(jnp.int32)
    ssl_label = ssl_label.at[0, 0].set(1)  # guarantee at least one pivot row

    # kg branch
    logits = ssl_kbert_classifier(bert_out_kg, cls_packed, pooling="first")
    # org branch (fixed-capacity pivot gather -> static kernel shape)
    pivot_preds_pad, n_pivots = ssl_kbert_decoder(
        bert_out_org, ssl_label, dec_packed, max_pivots=MAX_PIVOTS)
    jax.block_until_ready((logits, pivot_preds_pad, n_pivots))

    n_pivots = int(n_pivots)
    pivot_preds = pivot_preds_pad[:n_pivots]

    # references (same bf16-compute / f32-accumulate path)
    pooled = bert_out_kg[:, 0, :]
    ref_logits = _ref_head(pooled, *cls_raw)
    pivots = bert_out_org.reshape(-1, H)[jnp.flatnonzero(ssl_label.reshape(-1) > 0)]
    ref_preds = _ref_head(pivots, *dec_raw)

    assert logits.shape == (B, LABELS)
    assert pivot_preds.shape == (n_pivots, VOCAB)
    assert pivots.shape[0] == n_pivots
    assert jnp.allclose(logits, ref_logits, atol=2e-2, rtol=2e-2)
    assert jnp.allclose(pivot_preds, ref_preds, atol=2e-2, rtol=2e-2)

    print("KERNEL_OK")
</pallas_src>

<mosaic_0001>
module attributes {stable_mosaic.version = 11 : i64} {
  func.func @_head_kernel(%arg0: i32, %arg1: i32, %arg2: i32, %arg3: memref<8x128xbf16, #tpu.memory_space<vmem>>, %arg4: memref<128x128xbf16, #tpu.memory_space<vmem>>, %arg5: memref<1x128xf32, #tpu.memory_space<vmem>>, %arg6: memref<128x128xbf16, #tpu.memory_space<vmem>>, %arg7: memref<1x128xf32, #tpu.memory_space<vmem>>, %arg8: memref<8x128xf32, #tpu.memory_space<vmem>>, %arg9: memref<8x128xbf16, #tpu.memory_space<vmem>>) attributes {dimension_semantics = [#tpu.dimension_semantics<parallel>, #tpu.dimension_semantics<parallel>, #tpu.dimension_semantics<arbitrary>], iteration_bounds = array<i64: 1, 1, 1>, scalar_prefetch = 0 : i64, scratch_operands = 1 : i64, tpu.core_type = #tpu.core_type<tc>, window_params = [{transform_indices = @transform_0, window_bounds = array<i64: 8, 128>}, {pipeline_mode = #tpu.pipeline_mode<synchronous>, transform_indices = @transform_1, window_bounds = array<i64: 128, 128>}, {pipeline_mode = #tpu.pipeline_mode<synchronous>, transform_indices = @transform_2, window_bounds = array<i64: 1, 128>}, {pipeline_mode = #tpu.pipeline_mode<synchronous>, transform_indices = @transform_3, window_bounds = array<i64: 128, 128>}, {transform_indices = @transform_4, window_bounds = array<i64: 1, 128>}, {transform_indices = @transform_5, window_bounds = array<i64: 8, 128>}]} {
    %c0_i32 = arith.constant 0 : i32
    %0 = arith.cmpi eq, %arg2, %c0_i32 : i32
    %1 = arith.extui %0 : i1 to i32
    %c0_i32_0 = arith.constant 0 : i32
    %2 = arith.cmpi ne, %1, %c0_i32_0 : i32
    scf.if %2 {
      %c0_8 = arith.constant 0 : index
      %c0_9 = arith.constant 0 : index
      %10 = vector.load %arg3[%c0_8, %c0_9] : memref<8x128xbf16, #tpu.memory_space<vmem>>, vector<8x128xbf16>
      %c0_10 = arith.constant 0 : index
      %c0_11 = arith.constant 0 : index
      %11 = vector.load %arg4[%c0_10, %c0_11] : memref<128x128xbf16, #tpu.memory_space<vmem>>, vector<128x128xbf16>
      %cst_12 = arith.constant dense<0.000000e+00> : vector<8x128xf32>
      %12 = tpu.matmul %10, %11, %cst_12 {dimension_numbers = #tpu.dot_dimension_numbers<[1], [0], [0], [1], [0, 0, 1, 1], [], []>} : vector<8x128xbf16>, vector<128x128xbf16>, vector<8x128xf32> -> vector<8x128xf32>
      %c0_13 = arith.constant 0 : index
      %c0_14 = arith.constant 0 : index
      %13 = vector.load %arg5[%c0_13, %c0_14] : memref<1x128xf32, #tpu.memory_space<vmem>>, vector<1x128xf32>
      %14 = vector.broadcast %13 : vector<1x128xf32> to vector<8x128xf32>
      %15 = arith.addf %12, %14 : vector<8x128xf32>
      %cst_15 = arith.constant 0.000000e+00 : f32
      %16 = vector.broadcast %cst_15 : f32 to vector<8x128xf32>
      %17 = arith.maximumf %15, %16 : vector<8x128xf32>
      %18 = arith.truncf %17 : vector<8x128xf32> to vector<8x128xbf16>
      %c0_16 = arith.constant 0 : index
      %c0_17 = arith.constant 0 : index
      %19 = vector.load %arg9[%c0_16, %c0_17] : memref<8x128xbf16, #tpu.memory_space<vmem>>, vector<8x128xbf16>
      tpu.vector_store %arg9[%c0_16, %c0_17], %18 {strides = array<i32>} : memref<8x128xbf16, #tpu.memory_space<vmem>>, vector<8x128xbf16>,
    } else {
    }
    %c0 = arith.constant 0 : index
    %c0_1 = arith.constant 0 : index
    %3 = vector.load %arg9[%c0, %c0_1] : memref<8x128xbf16, #tpu.memory_space<vmem>>, vector<8x128xbf16>
    %c0_2 = arith.constant 0 : index
    %c0_3 = arith.constant 0 : index
    %4 = vector.load %arg6[%c0_2, %c0_3] : memref<128x128xbf16, #tpu.memory_space<vmem>>, vector<128x128xbf16>
    %cst = arith.constant dense<0.000000e+00> : vector<8x128xf32>
    %5 = tpu.matmul %3, %4, %cst {dimension_numbers = #tpu.dot_dimension_numbers<[1], [0], [0], [1], [0, 0, 1, 1], [], []>} : vector<8x128xbf16>, vector<128x128xbf16>, vector<8x128xf32> -> vector<8x128xf32>
    %c0_4 = arith.constant 0 : index
    %c0_5 = arith.constant 0 : index
    %6 = vector.load %arg7[%c0_4, %c0_5] : memref<1x128xf32, #tpu.memory_space<vmem>>, vector<1x128xf32>
    %7 = vector.broadcast %6 : vector<1x128xf32> to vector<8x128xf32>
    %8 = arith.addf %5, %7 : vector<8x128xf32>
    %c0_6 = arith.constant 0 : index
    %c0_7 = arith.constant 0 : index
    %9 = vector.load %arg8[%c0_6, %c0_7] : memref<8x128xf32, #tpu.memory_space<vmem>>, vector<8x128xf32>
    tpu.vector_store %arg8[%c0_6, %c0_7], %8 {strides = array<i32>} : memref<8x128xf32, #tpu.memory_space<vmem>>, vector<8x128xf32>,
    return
  }
  func.func @transform_0(%arg0: i32, %arg1: i32, %arg2: i32) -> (i32, i32) {
    %c0_i32 = arith.constant 0 : i32
    %c0_i32_0 = arith.constant 0 : i32
    return %arg1, %c0_i32 : i32, i32
  }
  func.func @transform_1(%arg0: i32, %arg1: i32, %arg2: i32) -> (i32, i32) {
    %c0_i32 = arith.constant 0 : i32
    %c0_i32_0 = arith.constant 0 : i32
    %c0_i32_1 = arith.constant 0 : i32
    return %c0_i32, %c0_i32_0 : i32, i32
  }
  func.func @transform_2(%arg0: i32, %arg1: i32, %arg2: i32) -> (i32, i32) {
    %c0_i32 = arith.constant 0 : i32
    %c0_i32_0 = arith.constant 0 : i32
    %c0_i32_1 = arith.constant 0 : i32
    return %c0_i32, %c0_i32_0 : i32, i32
  }
  func.func @transform_3(%arg0: i32, %arg1: i32, %arg2: i32) -> (i32, i32) {
    %c1_i32 = arith.constant 1 : i32
    %0 = arith.muli %arg0, %c1_i32 : i32
    %1 = arith.addi %0, %arg2 : i32
    %c0_i32 = arith.constant 0 : i32
    %c0_i32_0 = arith.constant 0 : i32
    return %c0_i32, %1 : i32, i32
  }
  func.func @transform_4(%arg0: i32, %arg1: i32, %arg2: i32) -> (i32, i32) {
    %c1_i32 = arith.constant 1 : i32
    %0 = arith.muli %arg0, %c1_i32 : i32
    %1 = arith.addi %0, %arg2 : i32
    %c0_i32 = arith.constant 0 : i32
    %c0_i32_0 = arith.constant 0 : i32
    return %c0_i32, %1 : i32, i32
  }
  func.func @transform_5(%arg0: i32, %arg1: i32, %arg2: i32) -> (i32, i32) {
    %c1_i32 = arith.constant 1 : i32
    %0 = arith.muli %arg0, %c1_i32 : i32
    %1 = arith.addi %0, %arg2 : i32
    %c0_i32 = arith.constant 0 : i32
    return %arg1, %1 : i32, i32
  }
}

</mosaic_0001>

<bundles_post_ra>
// kernel: tpu_custom_call.1
= control target key start
LH: loop header
LB: loop body
LE: loop exit
PB: predicated region body
PF: predicated region fallthrough
CT: control target
= control target key end

     0   :  { %10 = vsyncpa [#allocation4], 0  ;;  %s626_s0 = inlined_call_operand.hbm [shape: bf16[8,128], index: 0, kind: input, shape index: {}]   ;;  %s627_s1 = inlined_call_operand.hbm [shape: bf16[128,128], index: 1, kind: input, shape index: {}]   ;;  %s628_s2 = inlined_call_operand.vmem [shape: f32[1,128], index: 2, kind: input, shape index: {}]   ;;  %s629_s3 = inlined_call_operand.hbm [shape: bf16[128,128], index: 3, kind: input, shape index: {}]   ;;  %s630_s4 = inlined_call_operand.vmem [shape: f32[1,128], index: 4, kind: input, shape index: {}]   ;;  %s631_s5 = inlined_call_operand.hbm [shape: f32[8,128], index: 5, kind: output, shape index: {}]  }
   0x1   :  { %11 = vsyncpa [#allocation7], 0 }
   0x2   :  { %12 = vsyncpa [#allocation5], 0  ;;  %s528_s18 = smov [#allocation6]   ;;  %s434_s22 = scalar_lea.hbm %s627_s1, 1024 }
   0x3   :  { %s28_s19 = sshll.u32 %s528_s18, 4  ;;  %p435_p0 = scmp.ne.s32.totalorder %s627_s1, %s434_s22  ;;  %s29_s19 = int_to_ptr.vmem [resolvable:$true] %s28_s19 }
   0x4   :  { %p438_p1 = scmp.lt.u32.totalorder %s434_s22, %s627_s1 }
   0x6   :  { %p440_p2 = pnand %p438_p1, %p435_p0 }
   0x8   :  { %443 = shalt.err (!%p440_p2)
}
   0x9   :  { %s444_s27 = scalar_lea.vmem %s29_s19, 1024  ;;  %p449_p4 = scmp.lt.s32.totalorder %s29_s19, %s29_s19 }
   0xa   :  { %p445_p3 = scmp.ne.s32.totalorder %s29_s19, %s444_s27  ;;  %p450_p5 = scmp.lt.s32.totalorder %s444_s27, %s444_s27 }
   0xc   :  { %p451_p6 = por %p450_p5, %p449_p4 }
   0xe   :  { %p452_p7 = pnand %p451_p6, %p445_p3 }
  0x10   :  { %455 = shalt.err (!%p452_p7)
}
  0x11   :  { %s529_s28 = smov 64   ;;  %s530_s29 = smov 4  }
  0x12   :  { %34 = dma.hbm_to_vmem [thread:$0]  %s627_s1, 1024, %s29_s19, [#allocation7], %s529_s28, %s529_s28, %s530_s29  }
  0x13   :  { %s531_s7 = smov [#allocation3]   ;;  %s532_s9 = smov [#allocation8]  }
  0x14   :  { %s19_s8 = sshll.u32 %s531_s7, 4  ;;  %s45_s10 = sshll.u32 %s532_s9, 4  ;;  %s20_s8 = int_to_ptr.vmem [resolvable:$true] %s19_s8  ;;  %s46_s10 = int_to_ptr.vmem [resolvable:$true] %s45_s10 }
  0x15   :  { %s456_s13 = scalar_lea.hbm %s626_s0, 64 }
  0x16   :  { %p457_p8 = scmp.ne.s32.totalorder %s626_s0, %s456_s13  ;;  %p460_p9 = scmp.lt.u32.totalorder %s456_s13, %s626_s0 }
  0x18   :  { %p462_p10 = pnand %p460_p9, %p457_p8 }
  0x1a   :  { %465 = shalt.err (!%p462_p10)
}
  0x1b   :  { %s466_s1 = scalar_lea.vmem %s20_s8, 64  ;;  %p471_p12 = scmp.lt.s32.totalorder %s20_s8, %s20_s8 }
  0x1c   :  { %p467_p11 = scmp.ne.s32.totalorder %s20_s8, %s466_s1  ;;  %p472_p13 = scmp.lt.s32.totalorder %s466_s1, %s466_s1 }
  0x1e   :  { %p473_p0 = por %p472_p13, %p471_p12 }
  0x20   :  { %p474_p1 = pnand %p473_p0, %p467_p11 }
  0x22   :  { %477 = shalt.err (!%p474_p1)
}
  0x23   :  { %22 = dma.hbm_to_vmem [thread:$0]  %s626_s0, 64, %s20_s8, [#allocation4]  }
  0x24   :  { %s478_s22 = scalar_lea.hbm %s629_s3, 1024 }
  0x25   :  { %p479_p2 = scmp.ne.s32.totalorder %s629_s3, %s478_s22  ;;  %p482_p3 = scmp.lt.u32.totalorder %s478_s22, %s629_s3 }
  0x27   :  { %p484_p4 = pnand %p482_p3, %p479_p2 }
  0x29   :  { %487 = shalt.err (!%p484_p4)
}
  0x2a   :  { %s488_s27 = scalar_lea.vmem %s46_s10, 1024  ;;  %p493_p6 = scmp.lt.s32.totalorder %s46_s10, %s46_s10 }
  0x2b   :  { %p489_p5 = scmp.ne.s32.totalorder %s46_s10, %s488_s27  ;;  %p494_p7 = scmp.lt.s32.totalorder %s488_s27, %s488_s27 }
  0x2d   :  { %p495_p8 = por %p494_p7, %p493_p6 }
  0x2f   :  { %p496_p9 = pnand %p495_p8, %p489_p5 }
  0x31   :  { %499 = shalt.err (!%p496_p9)
}
  0x32   :  { %51 = dma.hbm_to_vmem [thread:$0]  %s629_s3, 1024, %s46_s10, [#allocation7], %s529_s28, %s529_s28, %s530_s29  }
  0x33   :  { %522 = dma.done.wait [#allocation4], 64  }
  0x34   :  { %523 = vsyncadd [#allocation4], 4294967232 }
  0x35   :  { %524 = dma.done.wait [#allocation7], 2048  }
  0x36   :  { %525 = vsyncadd [#allocation7], 4294965248  ;;  %v533_v0 = vmov 0.0   ;;  %vm534_vm0 = vmmov 0   ;;  %v418_v1 = vld [vmem:[#allocation6] sm:$0xff]   ;;  %v419_v2 = vld [vmem:[#allocation6 + $0x8] sm:$0xff]  }
  0x37   :  { %370 = vmatprep.subr.bf16.mxu0 %v533_v0  ;;  %386 = vmatprep.mubr.msk.bf16.mxu0 %vm534_vm0, %v533_v0  ;;  %v420_v3 = vld [vmem:[#allocation6 + $0x10] sm:$0xff]   ;;  %v426_v4 = vld [vmem:[#allocation8] sm:$0xff]   ;;  %v421_v5 = vld [vmem:[#allocation6 + $0x18] sm:$0xff]   ;;  %s535_s7 = smov [#allocation9]  }
  0x38   :  { %390 = vmatprep.subr.bf16.mxu1 %v533_v0  ;;  %406 = vmatprep.mubr.msk.bf16.mxu1 %vm534_vm0, %v533_v0  ;;  %v427_v6 = vld [vmem:[#allocation8 + $0x8] sm:$0xff]   ;;  %v422_v7 = vld [vmem:[#allocation6 + $0x20] sm:$0xff]   ;;  %v428_v8 = vld [vmem:[#allocation8 + $0x10] sm:$0xff]   ;;  %s321_s8 = sshll.u32 %s535_s7, 4  ;;  %s322_s8 = int_to_ptr.vmem [resolvable:$true] %s321_s8 }
  0x39   :  { %371 = vmatpush3.bf16.msra.mxu0 %v418_v1  ;;  %391 = vmatpush3.bf16.msra.mxu1 %v426_v4  ;;  %v423_v9 = vld [vmem:[#allocation6 + $0x28] sm:$0xff]   ;;  %v429_v10 = vld [vmem:[#allocation8 + $0x18] sm:$0xff]   ;;  %v424_v11 = vld [vmem:[#allocation6 + $0x30] sm:$0xff]   ;;  %p505_p11 = scmp.lt.s32.totalorder %s322_s8, %s322_s8 }
  0x3a   :  { %372 = vmatprep.subr.bf16.mxu0 %v533_v0  ;;  %392 = vmatprep.subr.bf16.mxu1 %v533_v0  ;;  %v425_v12 = vld [vmem:[#allocation6 + $0x38] sm:$0xff]   ;;  %v430_v14 = vld [vmem:[#allocation8 + $0x20] sm:$0xff]   ;;  %v431_v15 = vld [vmem:[#allocation8 + $0x28] sm:$0xff]  }
  0x3b   :  { %v84_v13 = vld [vmem:[#allocation3] sm:$0xf]  ;;  %v432_v16 = vld [vmem:[#allocation8 + $0x30] sm:$0xff]   ;;  %v334_v18 = vld [vmem:[%s628_s2] ss:$0 sm:$0xff]  ;;  %s500_s2 = scalar_lea.vmem %s322_s8, 128 }
  0x3c   :  { %v433_v17 = vld [vmem:[#allocation8 + $0x38] sm:$0xff]   ;;  %p501_p10 = scmp.ne.s32.totalorder %s322_s8, %s500_s2  ;;  %p506_p12 = scmp.lt.s32.totalorder %s500_s2, %s500_s2 }
  0x3d   :  { %373 = vmatpush3.bf16.msra.mxu0 %v419_v2  ;;  %393 = vmatpush3.bf16.msra.mxu1 %v427_v6  ;;  %v343_v27 = vld [vmem:[%s630_s4] ss:$0 sm:$0xff] }
  0x3e   :  { %374 = vmatprep.subr.bf16.mxu0 %v533_v0  ;;  %394 = vmatprep.subr.bf16.mxu1 %v533_v0  ;;  %p507_p13 = por %p506_p12, %p505_p11 }
  0x40   :  { %p508_p0 = pnand %p507_p13, %p501_p10 }
  0x41   :  { %375 = vmatpush3.bf16.msra.mxu0 %v420_v3  ;;  %395 = vmatpush3.bf16.msra.mxu1 %v428_v8 }
  0x42   :  { %376 = vmatprep.subr.bf16.mxu0 %v533_v0  ;;  %396 = vmatprep.subr.bf16.mxu1 %v533_v0 }
  0x45   :  { %377 = vmatpush3.bf16.msra.mxu0 %v421_v5  ;;  %397 = vmatpush3.bf16.msra.mxu1 %v429_v10 }
  0x46   :  { %378 = vmatprep.subr.bf16.mxu0 %v533_v0  ;;  %398 = vmatprep.subr.bf16.mxu1 %v533_v0 }
  0x49   :  { %379 = vmatpush3.bf16.msra.mxu0 %v422_v7  ;;  %399 = vmatpush3.bf16.msra.mxu1 %v430_v14 }
  0x4a   :  { %380 = vmatprep.subr.bf16.mxu0 %v533_v0  ;;  %400 = vmatprep.subr.bf16.mxu1 %v533_v0 }
  0x4d   :  { %381 = vmatpush3.bf16.msra.mxu0 %v423_v9  ;;  %401 = vmatpush3.bf16.msra.mxu1 %v431_v15 }
  0x4e   :  { %382 = vmatprep.subr.bf16.mxu0 %v533_v0  ;;  %402 = vmatprep.subr.bf16.mxu1 %v533_v0 }
  0x51   :  { %383 = vmatpush3.bf16.msra.mxu0 %v424_v11  ;;  %403 = vmatpush3.bf16.msra.mxu1 %v432_v16 }
  0x52   :  { %384 = vmatprep.subr.bf16.mxu0 %v533_v0  ;;  %404 = vmatprep.subr.bf16.mxu1 %v533_v0 }
  0x55   :  { %385 = vmatpush3.bf16.msra.mxu0 %v425_v12  ;;  %405 = vmatpush3.bf16.msra.mxu1 %v433_v17 }
  0x58   :  { %387 = vmatmul.mubr.bf16.vlgmr.msra.gmra.mrb[0].mxu0 %v84_v13 }
 0x12b   :  { %v190_v19 = vpop.f32.mrb[0].mxu0 }
 0x12c   :  { %v191_v20 = vadd.f32 %v334_v18, %v190_v19  ;;  %v388_v21 = vpop.f32.mrb[1].mxu0 }
 0x12d   :  { %v193_v22 = vpop.f32.mrb[2].mxu0 }
 0x12e   :  { %v196_v23 = vmax.f32 %v191_v20, 0.0  ;;  %v389_v24 = vpop.f32.mrb[3].mxu0 }
 0x130   :  { %v197_v25 = vpack.c.bf16 %v196_v23, %v196_v23 }
 0x132   :  { %198 = vst [vmem:[#allocation2] sm:$0xf] %v197_v25 }
 0x139   :  { %v199_v26 = vld [vmem:[#allocation2] sm:$0xf] }
 0x13a   :  { %407 = vmatmul.mubr.bf16.vlgmr.msra.gmra.mrb[0].mxu1 %v199_v26 }
 0x20d   :  { %v305_v28 = vpop.f32.mrb[0].mxu1 }
 0x20e   :  { %v306_v29 = vadd.f32 %v343_v27, %v305_v28  ;;  %v408_v30 = vpop.f32.mrb[1].mxu1 }
 0x20f   :  { %v308_v31 = vpop.f32.mrb[2].mxu1 }
 0x210   :  { %311 = vst [vmem:[#allocation9] sm:$0xff] %v306_v29  ;;  %v409_v32 = vpop.f32.mrb[3].mxu1 }
 0x211   :  { %511 = shalt.err (!%p508_p0)
}
 0x212   :  { %s512_s4 = scalar_lea.hbm %s631_s5, 128 }
 0x213   :  { %p513_p1 = scmp.ne.s32.totalorder %s631_s5, %s512_s4  ;;  %p516_p2 = scmp.lt.u32.totalorder %s512_s4, %s631_s5 }
 0x215   :  { %p518_p3 = pnand %p516_p2, %p513_p1 }
 0x217   :  { %521 = shalt.err (!%p518_p3)
}
 0x218   :  { %324 = dma.vmem_to_hbm [thread:$0]  %s322_s8, 128, %s631_s5, [#allocation5]  }
 0x219   :  { %526 = dma.done.wait [#allocation5], 128  }
 0x21a   :  { %527 = vsyncadd [#allocation5], 4294967168 }
 0x21b   :  { %328 = vsyncpa [#allocation4], 1 }
 0x21c   :  { %329 = vsyncpa [#allocation7], 1 }
 0x21d   :  { %330 = vsyncpa [#allocation5], 1 }

</bundles_post_ra>
